<compile_context>
chip_gen: v7x
topology: tpu7x:2x2x1
jax: 0.10.0
libtpu: 0.0.40
codegen_flags: <defaults>
</compile_context>

<pallas_src>
import jax
import jax.numpy as jnp
from jax.experimental import pallas as pl
from jax.experimental.pallas import tpu as pltpu

_LANE = 128
_SUBLANE = 8


def _round_up(n, m):
    return ((n + m - 1) // m) * m


def mlp_kernel(x_ref, w1_ref, b1_ref, w2_ref, b2_ref, o_ref):
    # ---- Layer 1 on the VPU (K = F is tiny, MXU would be pure overhead) ----
    x = x_ref[...]                      # (TB, F)   f32
    w1 = w1_ref[...]                    # (F, Hp)   f32, Hp lane-dense (mult of 128)
    acc = jnp.zeros((x.shape[0], w1.shape[1]), jnp.float32)
    for f in range(x.shape[1]):         # F is static & tiny -> unrolled broadcast FMAs
        acc = acc + x[:, f:f + 1] * w1[f:f + 1, :]
    h = jnp.maximum(acc + b1_ref[...], 0.0)        # (TB, Hp), f32 epilogue

    # ---- Layer 2 on the MXU: dense K = Hp = 128 contraction, lane-dense output ----
    y = jnp.dot(h, w2_ref[...], preferred_element_type=jnp.float32)
    o_ref[...] = (y + b2_ref[...]).astype(o_ref.dtype)   # full-width unmasked store


def net_forward(x, w1, b1, w2, b2, *, batch_tile=512):
    B, F = x.shape
    H = w1.shape[1]
    O = w2.shape[1]

    # Lane-dense widths for the hidden and output dims.
    Hp = _round_up(H, _LANE)
    Op = _round_up(O, _LANE)

    # Batch tile: <= batch_tile rows, sublane-aligned; pad B up to a multiple of it.
    TB = min(batch_tile, _round_up(B, _SUBLANE))
    Bp = _round_up(B, TB)

    # Zero-pad parameters / input in the wrapper (padding columns of h are zero
    # because w1/b1 padding is zero, so the padded w2 rows contribute nothing).
    xp = jnp.zeros((Bp, F), x.dtype).at[:B, :].set(x)
    w1p = jnp.zeros((F, Hp), w1.dtype).at[:, :H].set(w1)
    b1p = jnp.zeros((1, Hp), b1.dtype).at[:, :H].set(b1.reshape(1, H))
    w2p = jnp.zeros((Hp, Op), w2.dtype).at[:H, :O].set(w2)
    b2p = jnp.zeros((1, Op), b2.dtype).at[:, :O].set(b2.reshape(1, O))

    out_padded = pl.pallas_call(
        mlp_kernel,
        out_shape=jax.ShapeDtypeStruct((Bp, Op), x.dtype),
        grid=(Bp // TB,),
        in_specs=[
            pl.BlockSpec((TB, F), lambda i: (i, 0)),   # x: tiled over batch
            pl.BlockSpec((F, Hp), lambda i: (0, 0)),   # W1: resident
            pl.BlockSpec((1, Hp), lambda i: (0, 0)),   # b1: resident
            pl.BlockSpec((Hp, Op), lambda i: (0, 0)),  # W2: resident
            pl.BlockSpec((1, Op), lambda i: (0, 0)),   # b2: resident
        ],
        out_specs=pl.BlockSpec((TB, Op), lambda i: (i, 0)),
        compiler_params=pltpu.CompilerParams(
            dimension_semantics=("parallel",),         # batch axis shards across TCs
        ),
    )(xp, w1p, b1p, w2p, b2p)

    return out_padded[:B, :O]


def reference_forward(x, w1, b1, w2, b2):
    h = jnp.maximum(x @ w1 + b1, 0.0)
    return h @ w2 + b2


if __name__ == "__main__":
    key = jax.random.PRNGKey(0)
    k_data0, k_data1, k_w1, k_b1, k_w2, k_b2 = jax.random.split(key, 6)

    # Mirror the data-generation in the original script:
    # x0 ~ N(+2, 1), x1 ~ N(-2, 1), x = cat((x0, x1), 0)
    n_per_class, n_feature, n_hidden, n_output = 8, 2, 32, 2
    x0 = 2.0 + jax.random.normal(k_data0, (n_per_class, n_feature), jnp.float32)
    x1 = -2.0 + jax.random.normal(k_data1, (n_per_class, n_feature), jnp.float32)
    x = jnp.concatenate((x0, x1), axis=0)          # (16, 2)

    # Deterministic parameter init (uniform bound 1/sqrt(fan_in) like nn.Linear).
    bound1 = 1.0 / jnp.sqrt(n_feature)
    bound2 = 1.0 / jnp.sqrt(n_hidden)
    w1 = jax.random.uniform(k_w1, (n_feature, n_hidden), jnp.float32, -bound1, bound1)
    b1 = jax.random.uniform(k_b1, (1, n_hidden), jnp.float32, -bound1, bound1)
    w2 = jax.random.uniform(k_w2, (n_hidden, n_output), jnp.float32, -bound2, bound2)
    b2 = jax.random.uniform(k_b2, (1, n_output), jnp.float32, -bound2, bound2)

    out = net_forward(x, w1, b1, w2, b2)
    out = jax.block_until_ready(out)

    ref = reference_forward(x, w1, b1, w2, b2)
    assert out.shape == (2 * n_per_class, n_output)
    assert jnp.allclose(out, ref, atol=1e-5, rtol=1e-5)

    print("KERNEL_OK")
</pallas_src>

<mosaic_0001>
module attributes {stable_mosaic.version = 11 : i64} {
  func.func @mlp_kernel(%arg0: i32, %arg1: memref<16x2xf32, #tpu.memory_space<vmem>>, %arg2: memref<2x128xf32, #tpu.memory_space<vmem>>, %arg3: memref<1x128xf32, #tpu.memory_space<vmem>>, %arg4: memref<128x128xf32, #tpu.memory_space<vmem>>, %arg5: memref<1x128xf32, #tpu.memory_space<vmem>>, %arg6: memref<16x128xf32, #tpu.memory_space<vmem>>) attributes {dimension_semantics = [#tpu.dimension_semantics<parallel>], iteration_bounds = array<i64: 1>, scalar_prefetch = 0 : i64, scratch_operands = 0 : i64, tpu.core_type = #tpu.core_type<tc>, window_params = [{transform_indices = @transform_0, window_bounds = array<i64: 16, 2>}, {pipeline_mode = #tpu.pipeline_mode<synchronous>, transform_indices = @transform_1, window_bounds = array<i64: 2, 128>}, {pipeline_mode = #tpu.pipeline_mode<synchronous>, transform_indices = @transform_2, window_bounds = array<i64: 1, 128>}, {pipeline_mode = #tpu.pipeline_mode<synchronous>, transform_indices = @transform_3, window_bounds = array<i64: 128, 128>}, {pipeline_mode = #tpu.pipeline_mode<synchronous>, transform_indices = @transform_4, window_bounds = array<i64: 1, 128>}, {transform_indices = @transform_5, window_bounds = array<i64: 16, 128>}]} {
    %c0 = arith.constant 0 : index
    %c0_0 = arith.constant 0 : index
    %0 = vector.load %arg1[%c0, %c0_0] : memref<16x2xf32, #tpu.memory_space<vmem>>, vector<16x2xf32>
    %c0_1 = arith.constant 0 : index
    %c0_2 = arith.constant 0 : index
    %1 = vector.load %arg2[%c0_1, %c0_2] : memref<2x128xf32, #tpu.memory_space<vmem>>, vector<2x128xf32>
    %cst = arith.constant 0.000000e+00 : f32
    %2 = vector.broadcast %cst : f32 to vector<16x128xf32>
    %3 = vector.extract_strided_slice %0 {offsets = [0, 0], sizes = [16, 1], strides = [1, 1]} : vector<16x2xf32> to vector<16x1xf32>
    %4 = vector.extract_strided_slice %1 {offsets = [0, 0], sizes = [1, 128], strides = [1, 1]} : vector<2x128xf32> to vector<1x128xf32>
    %5 = vector.broadcast %3 : vector<16x1xf32> to vector<16x128xf32>
    %6 = vector.broadcast %4 : vector<1x128xf32> to vector<16x128xf32>
    %7 = arith.mulf %5, %6 : vector<16x128xf32>
    %8 = arith.addf %2, %7 : vector<16x128xf32>
    %9 = vector.extract_strided_slice %0 {offsets = [0, 1], sizes = [16, 1], strides = [1, 1]} : vector<16x2xf32> to vector<16x1xf32>
    %10 = vector.extract_strided_slice %1 {offsets = [1, 0], sizes = [1, 128], strides = [1, 1]} : vector<2x128xf32> to vector<1x128xf32>
    %11 = vector.broadcast %9 : vector<16x1xf32> to vector<16x128xf32>
    %12 = vector.broadcast %10 : vector<1x128xf32> to vector<16x128xf32>
    %13 = arith.mulf %11, %12 : vector<16x128xf32>
    %14 = arith.addf %8, %13 : vector<16x128xf32>
    %c0_3 = arith.constant 0 : index
    %c0_4 = arith.constant 0 : index
    %15 = vector.load %arg3[%c0_3, %c0_4] : memref<1x128xf32, #tpu.memory_space<vmem>>, vector<1x128xf32>
    %16 = vector.broadcast %15 : vector<1x128xf32> to vector<16x128xf32>
    %17 = arith.addf %14, %16 : vector<16x128xf32>
    %cst_5 = arith.constant 0.000000e+00 : f32
    %18 = vector.broadcast %cst_5 : f32 to vector<16x128xf32>
    %19 = arith.maximumf %17, %18 : vector<16x128xf32>
    %c0_6 = arith.constant 0 : index
    %c0_7 = arith.constant 0 : index
    %20 = vector.load %arg4[%c0_6, %c0_7] : memref<128x128xf32, #tpu.memory_space<vmem>>, vector<128x128xf32>
    %cst_8 = arith.constant dense<0.000000e+00> : vector<16x128xf32>
    %21 = tpu.matmul %19, %20, %cst_8 {dimension_numbers = #tpu.dot_dimension_numbers<[1], [0], [0], [1], [0, 0, 1, 1], [], []>} : vector<16x128xf32>, vector<128x128xf32>, vector<16x128xf32> -> vector<16x128xf32>
    %c0_9 = arith.constant 0 : index
    %c0_10 = arith.constant 0 : index
    %22 = vector.load %arg5[%c0_9, %c0_10] : memref<1x128xf32, #tpu.memory_space<vmem>>, vector<1x128xf32>
    %23 = vector.broadcast %22 : vector<1x128xf32> to vector<16x128xf32>
    %24 = arith.addf %21, %23 : vector<16x128xf32>
    %c0_11 = arith.constant 0 : index
    %c0_12 = arith.constant 0 : index
    %25 = vector.load %arg6[%c0_11, %c0_12] : memref<16x128xf32, #tpu.memory_space<vmem>>, vector<16x128xf32>
    tpu.vector_store %arg6[%c0_11, %c0_12], %24 {strides = array<i32>} : memref<16x128xf32, #tpu.memory_space<vmem>>, vector<16x128xf32>,
    return
  }
  func.func @transform_0(%arg0: i32) -> (i32, i32) {
    %c0_i32 = arith.constant 0 : i32
    %c0_i32_0 = arith.constant 0 : i32
    return %arg0, %c0_i32 : i32, i32
  }
  func.func @transform_1(%arg0: i32) -> (i32, i32) {
    %c0_i32 = arith.constant 0 : i32
    %c0_i32_0 = arith.constant 0 : i32
    %c0_i32_1 = arith.constant 0 : i32
    return %c0_i32, %c0_i32_0 : i32, i32
  }
  func.func @transform_2(%arg0: i32) -> (i32, i32) {
    %c0_i32 = arith.constant 0 : i32
    %c0_i32_0 = arith.constant 0 : i32
    %c0_i32_1 = arith.constant 0 : i32
    return %c0_i32, %c0_i32_0 : i32, i32
  }
  func.func @transform_3(%arg0: i32) -> (i32, i32) {
    %c0_i32 = arith.constant 0 : i32
    %c0_i32_0 = arith.constant 0 : i32
    %c0_i32_1 = arith.constant 0 : i32
    return %c0_i32, %c0_i32_0 : i32, i32
  }
  func.func @transform_4(%arg0: i32) -> (i32, i32) {
    %c0_i32 = arith.constant 0 : i32
    %c0_i32_0 = arith.constant 0 : i32
    %c0_i32_1 = arith.constant 0 : i32
    return %c0_i32, %c0_i32_0 : i32, i32
  }
  func.func @transform_5(%arg0: i32) -> (i32, i32) {
    %c0_i32 = arith.constant 0 : i32
    %c0_i32_0 = arith.constant 0 : i32
    return %arg0, %c0_i32 : i32, i32
  }
}

</mosaic_0001>

<bundles_post_ra>
// kernel: tpu_custom_call.1
= control target key start
LH: loop header
LB: loop body
LE: loop exit
PB: predicated region body
PF: predicated region fallthrough
CT: control target
= control target key end

     0   :  { %10 = vsyncpa [#allocation3], 0  ;;  %s426_s0 = inlined_call_operand.vmem [shape: f32[16,2], index: 0, kind: input, shape index: {}]   ;;  %s427_s1 = inlined_call_operand.vmem [shape: f32[2,128], index: 1, kind: input, shape index: {}]   ;;  %s428_s2 = inlined_call_operand.vmem [shape: f32[1,128], index: 2, kind: input, shape index: {}]   ;;  %s429_s3 = inlined_call_operand.hbm [shape: f32[128,128], index: 3, kind: input, shape index: {}]   ;;  %s430_s4 = inlined_call_operand.vmem [shape: f32[1,128], index: 4, kind: input, shape index: {}]   ;;  %s431_s5 = inlined_call_operand.hbm [shape: f32[16,128], index: 5, kind: output, shape index: {}]  }
   0x1   :  { %11 = vsyncpa [#allocation4], 0  ;;  %s345_s18 = smov [#allocation2]   ;;  %s297_s22 = scalar_lea.hbm %s429_s3, 2048 }
   0x2   :  { %s23_s19 = sshll.u32 %s345_s18, 4  ;;  %p298_p0 = scmp.ne.s32.totalorder %s429_s3, %s297_s22  ;;  %s24_s19 = int_to_ptr.vmem [resolvable:$true] %s23_s19 }
   0x3   :  { %p301_p1 = scmp.lt.u32.totalorder %s297_s22, %s429_s3 }
   0x5   :  { %p303_p2 = pnand %p301_p1, %p298_p0 }
   0x7   :  { %306 = shalt.err (!%p303_p2)
}
   0x8   :  { %s307_s27 = scalar_lea.vmem %s24_s19, 2048  ;;  %p312_p4 = scmp.lt.s32.totalorder %s24_s19, %s24_s19 }
   0x9   :  { %p308_p3 = scmp.ne.s32.totalorder %s24_s19, %s307_s27  ;;  %p313_p5 = scmp.lt.s32.totalorder %s307_s27, %s307_s27 }
   0xb   :  { %p314_p6 = por %p313_p5, %p312_p4 }
   0xd   :  { %p315_p7 = pnand %p314_p6, %p308_p3 }
   0xf   :  { %318 = shalt.err (!%p315_p7)
}
  0x10   :  { %s346_s28 = smov 128   ;;  %s347_s29 = smov 8  }
  0x11   :  { %29 = dma.hbm_to_vmem [thread:$0]  %s429_s3, 2048, %s24_s19, [#allocation3], %s346_s28, %s346_s28, %s347_s29  }
  0x12   :  { %341 = dma.done.wait [#allocation3], 2048  }
  0x13   :  { %342 = vsyncadd [#allocation3], 4294965248  ;;  %v348_v0 = vmov 0   ;;  %v36_v1 = vld [vmem:[%s426_s0 + $0x8] sm:$0xff]  ;;  %v35_v2 = vld [vmem:[%s426_s0] sm:$0xff]  ;;  %v349_v9 = vmov 1   ;;  %v48_v28 = vlaneseq }
  0x14   :  { %295 = vset.pattern.permute.xlu1 %v348_v0  ;;  %293 = vset.pattern.permute.xlu0 %v348_v0  ;;  %v83_v3 = vld [vmem:[#allocation2] sm:$0xff]  ;;  %v84_v4 = vld [vmem:[#allocation2 + $0x8] sm:$0xff]  ;;  %v85_v5 = vld [vmem:[#allocation2 + $0x10] sm:$0xff]  ;;  %s350_s14 = smov [#allocation5]  }
  0x15   :  { %45 = vperm.xlu1 %295, %v36_v1   ;;  %40 = vperm.xlu0 %293, %v35_v2   ;;  %v86_v6 = vld [vmem:[#allocation2 + $0x18] sm:$0xff]  ;;  %v255_v7 = vpack.c.bf16 %v84_v4, %v83_v3  ;;  %v87_v10 = vld [vmem:[#allocation2 + $0x20] sm:$0xff]  ;;  %v88_v11 = vld [vmem:[#allocation2 + $0x28] sm:$0xff]  ;;  %v49_v29 = vshrl.u32 %v48_v28, 7  ;;  %s188_s15 = sshll.u32 %s350_s14, 4  ;;  %s189_s15 = int_to_ptr.vmem [resolvable:$true] %s188_s15 }
  0x16   :  { %v259_v8 = vpack.c.bf16 %v86_v6, %v85_v5  ;;  %v263_v12 = vpack.c.bf16 %v88_v11, %v87_v10  ;;  %v89_v13 = vld [vmem:[#allocation2 + $0x30] sm:$0xff]  ;;  %v90_v14 = vld [vmem:[#allocation2 + $0x38] sm:$0xff]  ;;  %v91_v16 = vld [vmem:[#allocation2 + $0x40] sm:$0xff]  ;;  %p324_p9 = scmp.lt.s32.totalorder %s189_s15, %s189_s15 }
  0x17   :  { %256 = vmatprep.subr.bf16.mxu0 %v255_v7  ;;  %v267_v15 = vpack.c.bf16 %v90_v14, %v89_v13  ;;  %v92_v17 = vld [vmem:[#allocation2 + $0x48] sm:$0xff]  ;;  %v93_v19 = vld [vmem:[#allocation2 + $0x50] sm:$0xff]  ;;  %v94_v20 = vld [vmem:[#allocation2 + $0x58] sm:$0xff]  ;;  %v50_v30 = vsub.s32 0, %v49_v29  ;;  %v66_v31 = vsub.s32 1, %v49_v29 }
  0x18   :  { %258 = vmatpush3.bf16.msra.mxu0 %v255_v7  ;;  %v271_v18 = vpack.c.bf16 %v92_v17, %v91_v16  ;;  %v275_v21 = vpack.c.bf16 %v94_v20, %v93_v19  ;;  %v95_v22 = vld [vmem:[#allocation2 + $0x60] sm:$0xff]  ;;  %v96_v23 = vld [vmem:[#allocation2 + $0x68] sm:$0xff]  ;;  %v97_v25 = vld [vmem:[#allocation2 + $0x70] sm:$0xff] }
  0x19   :  { %296 = vset.pattern.permute.xlu1 %v349_v9  ;;  %294 = vset.pattern.permute.xlu0 %v349_v9  ;;  %v279_v24 = vpack.c.bf16 %v96_v23, %v95_v22  ;;  %v98_v26 = vld [vmem:[#allocation2 + $0x78] sm:$0xff]  ;;  %v37_v32 = vld [vmem:[%s427_s1] sm:$0x3] }
  0x1a   :  { %61 = vperm.xlu1 %296, %v36_v1   ;;  %57 = vperm.xlu0 %294, %v35_v2   ;;  %v283_v27 = vpack.c.bf16 %v98_v26, %v97_v25  ;;  %v51_v35 = vrot.slane %v37_v32, %v50_v30  ;;  %v67_v36 = vrot.slane %v37_v32, %v66_v31  ;;  %v200_v43 = vld [vmem:[%s428_s2] ss:$0 sm:$0xff]  ;;  %s319_s2 = scalar_lea.vmem %s189_s15, 256 }
  0x1b   :  { %260 = vmatprep.subr.bf16.mxu0 %v259_v8  ;;  %v201_v50 = vld [vmem:[%s430_s4] ss:$0 sm:$0xff]  ;;  %p320_p8 = scmp.ne.s32.totalorder %s189_s15, %s319_s2  ;;  %p325_p10 = scmp.lt.s32.totalorder %s319_s2, %s319_s2 }
  0x1c   :  { %262 = vmatpush3.bf16.msra.mxu0 %v259_v8 }
  0x1d   :  { %264 = vmatprep.subr.bf16.mxu0 %v263_v12  ;;  %p326_p11 = por %p325_p10, %p324_p9 }
  0x1f   :  { %p327_p12 = pnand %p326_p11, %p320_p8 }
  0x20   :  { %266 = vmatpush3.bf16.msra.mxu0 %v263_v12 }
  0x21   :  { %268 = vmatprep.subr.bf16.mxu0 %v267_v15 }
  0x24   :  { %270 = vmatpush3.bf16.msra.mxu0 %v267_v15 }
  0x25   :  { %272 = vmatprep.subr.bf16.mxu0 %v271_v18 }
  0x28   :  { %274 = vmatpush3.bf16.msra.mxu0 %v271_v18 }
  0x29   :  { %276 = vmatprep.subr.bf16.mxu0 %v275_v21 }
  0x2c   :  { %278 = vmatpush3.bf16.msra.mxu0 %v275_v21 }
  0x2d   :  { %280 = vmatprep.subr.bf16.mxu0 %v279_v24 }
  0x30   :  { %282 = vmatpush3.bf16.msra.mxu0 %v279_v24 }
  0x31   :  { %284 = vmatprep.subr.bf16.mxu0 %v283_v27 }
  0x34   :  { %286 = vmatpush3.bf16.msra.mxu0 %v283_v27 }
  0x94   :  { %v41_v33 = vpop.permute.xlu0 %40  ;;  %v46_v34 = vpop.permute.xlu1 %45 }
  0x95   :  { %v52_v39 = vmul.f32 %v51_v35, %v41_v33  ;;  %v53_v40 = vmul.f32 %v51_v35, %v46_v34 }
  0x99   :  { %v62_v37 = vpop.permute.xlu1 %61  ;;  %v58_v38 = vpop.permute.xlu0 %57 }
  0x9a   :  { %v69_v41 = vmul.f32 %v67_v36, %v62_v37  ;;  %v68_v42 = vmul.f32 %v67_v36, %v58_v38 }
  0x9c   :  { %v71_v44 = vadd.f32 %v69_v41, %v53_v40  ;;  %v70_v45 = vadd.f32 %v68_v42, %v52_v39 }
  0x9e   :  { %v79_v46 = vadd.f32 %v200_v43, %v70_v45  ;;  %v80_v47 = vadd.f32 %v200_v43, %v71_v44 }
  0xa0   :  { %v81_v48 = vmax.f32 %v79_v46, 0.0  ;;  %v82_v49 = vmax.f32 %v80_v47, 0.0 }
  0xa2   :  { %252 = vmatprep.mubr.f32.mxu0 %v81_v48 }
  0xa3   :  { %253 = vmatmul.mubr.f32.vlgmr.msra.gmra.mrb[0].mxu0 %v82_v49 }
 0x176   :  { %v254_v51 = vpop.f32.mrb[0].mxu0 }
 0x177   :  { %v178_v52 = vadd.f32 %v254_v51, %v201_v50  ;;  %v172_v53 = vpop.f32.mrb[1].mxu0 }
 0x178   :  { %v173_v54 = vadd.f32 %v201_v50, %v172_v53 }
 0x179   :  { %182 = vst [vmem:[#allocation5 + $0x8] sm:$0xff] %v178_v52 }
 0x17a   :  { %181 = vst [vmem:[#allocation5] sm:$0xff] %v173_v54 }
 0x17b   :  { %330 = shalt.err (!%p327_p12)
}
 0x17c   :  { %s331_s4 = scalar_lea.hbm %s431_s5, 256 }
 0x17d   :  { %p332_p13 = scmp.ne.s32.totalorder %s431_s5, %s331_s4  ;;  %p335_p0 = scmp.lt.u32.totalorder %s331_s4, %s431_s5 }
 0x17f   :  { %p337_p1 = pnand %p335_p0, %p332_p13 }
 0x181   :  { %340 = shalt.err (!%p337_p1)
}
 0x182   :  { %194 = dma.vmem_to_hbm [thread:$0]  %s189_s15, 256, %s431_s5, [#allocation4], %s346_s28, %s346_s28, %s347_s29  }
 0x183   :  { %343 = dma.done.wait [#allocation4], 256  }
 0x184   :  { %344 = vsyncadd [#allocation4], 4294967040 }
 0x185   :  { %198 = vsyncpa [#allocation3], 1 }
 0x186   :  { %199 = vsyncpa [#allocation4], 1 }

</bundles_post_ra>
